<compile_context>
chip_gen: v5e
topology: v5e:2x2
jax: 0.10.0
libtpu: 0.0.40
codegen_flags: <defaults>
</compile_context>

<pallas_src>
import functools
import math

import numpy as np
import jax
import jax.numpy as jnp
from jax.experimental import pallas as pl
from jax.experimental.pallas import tpu as pltpu


SIZES = (1, 2, 3, 6)

_TM_CAP = 256                      # v7x-safe M tile cap
_WEIGHT_RESIDENT_BYTES = 28 << 20  # 2x-buffered fused-weight budget
_VMEM_LIMIT_BYTES = 48 << 20       # < 64 MiB physical on v7x, fine on v5e/v6e


def _round_up(x, m):
    return (x + m - 1) // m * m


def _choose_tm(m, cap=_TM_CAP):
    """Largest multiple of 16 that divides m and is <= cap (no pad needed).

    Falls back to a padded tile if m has no such divisor.  Keeping >= 2 M
    blocks (when m > cap) leaves the 'parallel' M axis splittable across the
    two v7x TensorCores.
    """
    best = 0
    for d in range(16, min(m, cap) + 1, 16):
        if m % d == 0:
            best = d
    if best >= 16:
        return best, m
    tm = min(_round_up(max(m, 1), 16), cap)
    return tm, _round_up(m, tm)


# ----------------------------------------------------------------------------
# Fused (two-slab) matmul + bias + ReLU Pallas kernel
#   o = relu(x1 @ w1 + x2 @ w2 + b), bf16 operands, f32 MXU accumulation
# ----------------------------------------------------------------------------
def _psp_mm_kernel(x1_ref, x2_ref, w1_ref, w2_ref, b_ref, o_ref):
    acc = jnp.dot(x1_ref[...], w1_ref[...], preferred_element_type=jnp.float32)
    acc = acc + jnp.dot(x2_ref[...], w2_ref[...],
                        preferred_element_type=jnp.float32)
    o_ref[...] = jnp.maximum(acc + b_ref[...], 0.0)


def matmul2_bias_relu(x1, x2, w1_p, w2_p, b_p, n_valid):
    """relu(x1 @ w1 + x2 @ w2 + b) with the weights held resident in VMEM.

    x1   : (M, K1) bf16   mixed pyramid-stage activations
    x2   : (M, K2) bf16   raw feature activations
    w1_p : (K1, Np) bf16  folded stage weights (pre-transposed / N-padded)
    w2_p : (K2, Np) bf16  raw-feats slab of the bottleneck weight
    b_p  : (1, Np)  f32   pre-padded bias
    returns (M, n_valid) float32
    """
    M, K1 = x1.shape
    _, K2 = x2.shape
    Np = w1_p.shape[1]

    tm, Mp = _choose_tm(M)
    if Mp != M:                       # rare fallback; common case: no copy
        x1 = jnp.pad(x1, ((0, Mp - M), (0, 0)))
        x2 = jnp.pad(x2, ((0, Mp - M), (0, 0)))

    # Keep the whole fused weight VMEM-resident (tn == Np) whenever it fits a
    # conservative, worst-case-double-buffered budget; otherwise tile N.
    w_bytes_2buf = 2 * (K1 + K2) * Np * 2
    if w_bytes_2buf <= _WEIGHT_RESIDENT_BYTES:
        tn = Np
    else:
        per_col = 2 * (K1 + K2) * 2
        tn = max(128, (_WEIGHT_RESIDENT_BYTES // per_col) // 128 * 128)
        while Np % tn:                # Np is a multiple of 128 -> terminates
            tn -= 128

    grid = (Mp // tm, Np // tn)       # no K axis: one full-K dot per tile

    out = pl.pallas_call(
        _psp_mm_kernel,
        out_shape=jax.ShapeDtypeStruct((Mp, Np), jnp.float32),
        grid_spec=pltpu.PrefetchScalarGridSpec(
            num_scalar_prefetch=0,
            grid=grid,
            in_specs=[
                pl.BlockSpec((tm, K1), lambda i, j: (i, 0)),   # x1
                pl.BlockSpec((tm, K2), lambda i, j: (i, 0)),   # x2
                pl.BlockSpec((K1, tn), lambda i, j: (0, j)),   # w1 (invariant
                pl.BlockSpec((K2, tn), lambda i, j: (0, j)),   # w2  when tn==Np)
                pl.BlockSpec((1, tn), lambda i, j: (0, j)),    # bias
            ],
            out_specs=pl.BlockSpec((tm, tn), lambda i, j: (i, j))),
        compiler_params=pltpu.CompilerParams(
            dimension_semantics=("parallel", "parallel"),
            vmem_limit_bytes=_VMEM_LIMIT_BYTES),
    )(x1, x2, w1_p, w2_p, b_p)

    if (Mp, Np) != (M, n_valid):
        out = out[:M, :n_valid]
    return out


# ----------------------------------------------------------------------------
# Fixed spatial resampling matrices (exact, tiny, kept off the Pallas path)
# ----------------------------------------------------------------------------
def adaptive_pool_matrix(in_size, out_size):
    """nn.AdaptiveAvgPool2d 1-D bin-averaging matrix, shape (out, in)."""
    M = np.zeros((out_size, in_size), np.float32)
    for i in range(out_size):
        s = (i * in_size) // out_size
        e = -((-(i + 1) * in_size) // out_size)   # ceil
        M[i, s:e] = 1.0 / (e - s)
    return M


def bilinear_matrix(in_size, out_size):
    """1-D bilinear interpolation matrix, shape (out, in).

    Matches F.interpolate(mode='bilinear', align_corners=False), which is what
    the deprecated F.upsample call resolves to in current PyTorch.  (Very old
    PyTorch behaved like align_corners=True; swap the weight formula if
    bit-matching a legacy checkpoint.)
    """
    M = np.zeros((out_size, in_size), np.float32)
    scale = in_size / out_size
    for o in range(out_size):
        src = max((o + 0.5) * scale - 0.5, 0.0)
        i0 = min(int(math.floor(src)), in_size - 1)
        i1 = min(i0 + 1, in_size - 1)
        f = src - i0
        M[o, i0] += 1.0 - f
        M[o, i1] += f
    return M


# ----------------------------------------------------------------------------
# One-time weight / layout preparation (outside the hot path)
# ----------------------------------------------------------------------------
def prepare_psp(params, H, W, sizes=SIZES):
    S = len(sizes)
    C = params["stage_w"][0].shape[1]
    N = params["bottleneck_w"].shape[0]

    # (upsample o adaptive-pool) spatial mixing matrices per pyramid stage.
    mix_h = np.stack([bilinear_matrix(s, H) @ adaptive_pool_matrix(H, s)
                      for s in sizes])                              # (S, H, H)
    mix_w = np.stack([bilinear_matrix(s, W) @ adaptive_pool_matrix(W, s)
                      for s in sizes])                              # (S, W, W)

    # Fold the bias-free per-stage 1x1 convs into the bottleneck weight
    # (1x1 convs commute with spatial resampling, so this is exact), keeping
    # the two K-slabs separate so the wrapper never has to concat activations.
    wb = params["bottleneck_w"].astype(jnp.float32)                 # (N, (S+1)C)
    blocks = [wb[:, i * C:(i + 1) * C]
              @ params["stage_w"][i].astype(jnp.float32) for i in range(S)]
    w1 = jnp.concatenate(blocks, axis=1)                            # (N, S*C)
    w2 = wb[:, S * C:]                                              # (N, C)

    # Pre-transpose / N-pad / bf16-cast ONCE (single bf16 rounding of the
    # folded product).
    Np = _round_up(N, 128)
    w1_p = jnp.pad(w1.T, ((0, 0), (0, Np - N))).astype(jnp.bfloat16)  # (S*C, Np)
    w2_p = jnp.pad(w2.T, ((0, 0), (0, Np - N))).astype(jnp.bfloat16)  # (C,   Np)
    b_p = jnp.pad(params["bottleneck_b"].astype(jnp.float32),
                  (0, Np - N)).reshape(1, Np)

    return dict(mix_h=jnp.asarray(mix_h), mix_w=jnp.asarray(mix_w),
                w1_p=w1_p, w2_p=w2_p, b_p=b_p, n_out=N)


# ----------------------------------------------------------------------------
# PSPModule forward (NCHW at the boundary, (rows, lanes) bf16 internally)
# ----------------------------------------------------------------------------
def psp_forward(feats, prep):
    """feats: (B, C, H, W) -> (B, out_features, H, W) float32."""
    B, C, H, W = feats.shape
    S = prep["mix_h"].shape[0]
    M = B * H * W

    # NHWC + bf16 once; all large intermediates below stay in bf16.
    fh = jnp.transpose(feats, (0, 2, 3, 1)).astype(jnp.bfloat16)
    # Exact pooled-then-upsampled maps for all pyramid stages in one small
    # einsum (mixing matrices stay f32; output cast straight to bf16).
    mixed = jnp.einsum("syh,sxw,bhwc->byxsc",
                       prep["mix_h"], prep["mix_w"], fh).astype(jnp.bfloat16)

    x1 = mixed.reshape(M, S * C)          # contiguous reshape, no copy
    x2 = fh.reshape(M, C)
    y = matmul2_bias_relu(x1, x2, prep["w1_p"], prep["w2_p"], prep["b_p"],
                          prep["n_out"])
    return jnp.transpose(y.reshape(B, H, W, prep["n_out"]), (0, 3, 1, 2))


# ----------------------------------------------------------------------------
# Pure-JAX f32 reference mirroring the PyTorch module op-by-op
# ----------------------------------------------------------------------------
def psp_reference(feats, params, sizes=SIZES):
    B, C, H, W = feats.shape
    priors = []
    for size, w_s in zip(sizes, params["stage_w"]):
        ph, pw = adaptive_pool_matrix(H, size), adaptive_pool_matrix(W, size)
        pooled = jnp.einsum("yh,xw,bchw->bcyx", ph, pw, feats)
        conv = jnp.einsum("oc,bchw->bohw", w_s, pooled)
        uh, uw = bilinear_matrix(size, H), bilinear_matrix(size, W)
        priors.append(jnp.einsum("yh,xw,bchw->bcyx", uh, uw, conv))
    priors.append(feats)
    cat = jnp.concatenate(priors, axis=1)
    out = jnp.einsum("oc,bchw->bohw", params["bottleneck_w"], cat)
    out = out + params["bottleneck_b"][None, :, None, None]
    return jnp.maximum(out, 0.0)


# ----------------------------------------------------------------------------
# Deterministic parameter initialization
# ----------------------------------------------------------------------------
def init_params(key, features, out_features, sizes=SIZES):
    S = len(sizes)
    ks = jax.random.split(key, S + 2)
    stage_w = [jax.random.normal(ks[i], (features, features), jnp.float32)
               / np.sqrt(features) for i in range(S)]
    bottleneck_w = (jax.random.normal(ks[S],
                                      (out_features, features * (S + 1)),
                                      jnp.float32)
                    / np.sqrt(features * (S + 1)))
    bottleneck_b = 0.1 * jax.random.normal(ks[S + 1], (out_features,),
                                           jnp.float32)
    return {"stage_w": stage_w,
            "bottleneck_w": bottleneck_w,
            "bottleneck_b": bottleneck_b}


# ----------------------------------------------------------------------------
if __name__ == "__main__":
    key = jax.random.PRNGKey(0)
    kx, kp = jax.random.split(key)

    B, C, H, W = 2, 64, 16, 16       # features = 64
    OUT = 128                        # out_features
    feats = jax.random.normal(kx, (B, C, H, W), jnp.float32)
    params = init_params(kp, C, OUT)

    prep = prepare_psp(params, H, W)
    fwd = jax.jit(functools.partial(psp_forward, prep=prep))

    out = jax.block_until_ready(fwd(feats))
    assert out.shape == (B, OUT, H, W)
    assert bool(jnp.all(out >= 0.0))          # ReLU epilogue sanity

    ref = jax.block_until_ready(psp_reference(feats, params))
    err = float(jnp.max(jnp.abs(out - ref)))
    assert err < 5e-2, f"max abs err vs reference = {err}"

    print("KERNEL_OK")
</pallas_src>

<mosaic_0001>
module attributes {stable_mosaic.version = 11 : i64} {
  func.func @_psp_mm_kernel(%arg0: i32, %arg1: i32, %arg2: memref<256x256xbf16, #tpu.memory_space<vmem>>, %arg3: memref<256x64xbf16, #tpu.memory_space<vmem>>, %arg4: memref<256x128xbf16, #tpu.memory_space<vmem>>, %arg5: memref<64x128xbf16, #tpu.memory_space<vmem>>, %arg6: memref<1x128xf32, #tpu.memory_space<vmem>>, %arg7: memref<256x128xf32, #tpu.memory_space<vmem>>) attributes {dimension_semantics = [#tpu.dimension_semantics<parallel>, #tpu.dimension_semantics<parallel>], iteration_bounds = array<i64: 2, 1>, scalar_prefetch = 0 : i64, scratch_operands = 0 : i64, tpu.core_type = #tpu.core_type<tc>, window_params = [{transform_indices = @transform_0, window_bounds = array<i64: 256, 256>}, {transform_indices = @transform_1, window_bounds = array<i64: 256, 64>}, {transform_indices = @transform_2, window_bounds = array<i64: 256, 128>}, {transform_indices = @transform_3, window_bounds = array<i64: 64, 128>}, {transform_indices = @transform_4, window_bounds = array<i64: 1, 128>}, {transform_indices = @transform_5, window_bounds = array<i64: 256, 128>}]} {
    %c0 = arith.constant 0 : index
    %c0_0 = arith.constant 0 : index
    %0 = vector.load %arg2[%c0, %c0_0] : memref<256x256xbf16, #tpu.memory_space<vmem>>, vector<256x256xbf16>
    %c0_1 = arith.constant 0 : index
    %c0_2 = arith.constant 0 : index
    %1 = vector.load %arg4[%c0_1, %c0_2] : memref<256x128xbf16, #tpu.memory_space<vmem>>, vector<256x128xbf16>
    %cst = arith.constant dense<0.000000e+00> : vector<256x128xf32>
    %2 = tpu.matmul %0, %1, %cst {dimension_numbers = #tpu.dot_dimension_numbers<[1], [0], [0], [1], [0, 0, 1, 1], [], []>} : vector<256x256xbf16>, vector<256x128xbf16>, vector<256x128xf32> -> vector<256x128xf32>
    %c0_3 = arith.constant 0 : index
    %c0_4 = arith.constant 0 : index
    %3 = vector.load %arg3[%c0_3, %c0_4] : memref<256x64xbf16, #tpu.memory_space<vmem>>, vector<256x64xbf16>
    %c0_5 = arith.constant 0 : index
    %c0_6 = arith.constant 0 : index
    %4 = vector.load %arg5[%c0_5, %c0_6] : memref<64x128xbf16, #tpu.memory_space<vmem>>, vector<64x128xbf16>
    %cst_7 = arith.constant dense<0.000000e+00> : vector<256x128xf32>
    %5 = tpu.matmul %3, %4, %cst_7 {dimension_numbers = #tpu.dot_dimension_numbers<[1], [0], [0], [1], [0, 0, 1, 1], [], []>} : vector<256x64xbf16>, vector<64x128xbf16>, vector<256x128xf32> -> vector<256x128xf32>
    %6 = arith.addf %2, %5 : vector<256x128xf32>
    %c0_8 = arith.constant 0 : index
    %c0_9 = arith.constant 0 : index
    %7 = vector.load %arg6[%c0_8, %c0_9] : memref<1x128xf32, #tpu.memory_space<vmem>>, vector<1x128xf32>
    %8 = vector.broadcast %7 : vector<1x128xf32> to vector<256x128xf32>
    %9 = arith.addf %6, %8 : vector<256x128xf32>
    %cst_10 = arith.constant 0.000000e+00 : f32
    %10 = vector.broadcast %cst_10 : f32 to vector<256x128xf32>
    %11 = arith.maximumf %9, %10 : vector<256x128xf32>
    %c0_11 = arith.constant 0 : index
    %c0_12 = arith.constant 0 : index
    %12 = vector.load %arg7[%c0_11, %c0_12] : memref<256x128xf32, #tpu.memory_space<vmem>>, vector<256x128xf32>
    tpu.vector_store %arg7[%c0_11, %c0_12], %11 {strides = array<i32>} : memref<256x128xf32, #tpu.memory_space<vmem>>, vector<256x128xf32>,
    return
  }
  func.func @transform_0(%arg0: i32, %arg1: i32) -> (i32, i32) {
    %c0_i32 = arith.constant 0 : i32
    %c0_i32_0 = arith.constant 0 : i32
    return %arg0, %c0_i32 : i32, i32
  }
  func.func @transform_1(%arg0: i32, %arg1: i32) -> (i32, i32) {
    %c0_i32 = arith.constant 0 : i32
    %c0_i32_0 = arith.constant 0 : i32
    return %arg0, %c0_i32 : i32, i32
  }
  func.func @transform_2(%arg0: i32, %arg1: i32) -> (i32, i32) {
    %c0_i32 = arith.constant 0 : i32
    %c0_i32_0 = arith.constant 0 : i32
    return %c0_i32, %arg1 : i32, i32
  }
  func.func @transform_3(%arg0: i32, %arg1: i32) -> (i32, i32) {
    %c0_i32 = arith.constant 0 : i32
    %c0_i32_0 = arith.constant 0 : i32
    return %c0_i32, %arg1 : i32, i32
  }
  func.func @transform_4(%arg0: i32, %arg1: i32) -> (i32, i32) {
    %c0_i32 = arith.constant 0 : i32
    %c0_i32_0 = arith.constant 0 : i32
    return %c0_i32, %arg1 : i32, i32
  }
  func.func @transform_5(%arg0: i32, %arg1: i32) -> (i32, i32) {
    %c0_i32 = arith.constant 0 : i32
    return %arg0, %arg1 : i32, i32
  }
}

</mosaic_0001>

<bundles_post_ra>
// kernel: psp_forward.1
= control target key start
LH: loop header
LB: loop body
LE: loop exit
PB: predicated region body
PF: predicated region fallthrough
CT: control target
= control target key end

     0   :  { %10 = vsyncpa [#allocation3], 0  ;;  %s2311_s0 = inlined_call_operand.vmem [shape: bf16[512,256], index: 0, kind: input, shape index: {}]   ;;  %s2312_s1 = inlined_call_operand.vmem [shape: bf16[512,64], index: 1, kind: input, shape index: {}]   ;;  %s2313_s2 = inlined_call_operand.vmem [shape: bf16[256,128], index: 2, kind: input, shape index: {}]   ;;  %s2314_s3 = inlined_call_operand.vmem [shape: bf16[64,128], index: 3, kind: input, shape index: {}]   ;;  %s2315_s4 = inlined_call_operand.vmem [shape: f32[1,128], index: 4, kind: input, shape index: {}]   ;;  %s2316_s5 = inlined_call_operand.hbm [shape: f32[512,128], index: 5, kind: output, shape index: {}]  }
   0x1   :  { %12 = vsyncpa [#allocation3 + $0x1], 0  ;;  %s1904_s18 = smov 0   ;;  %s1906_s19 = smov 0  }
   0x2   :  { %s1908_s20 = smov 0   ;;  %s1910_s21 = smov 0  }
   0x3   :  { %s1912_s22 = smov 0   ;;  %s1914_s23 = smov 0  }
   0x4 LB: > { %s1337_s24 = sadd.s32 4294967295, %s1870_s23   ;;  %s1338_s25 = sadd.s32 4294967294, %s1870_s23   ;;  %s1870_s23 = sphi %s1914_s23, %s18_s23   ;;  %s1866_s22 = sphi %s1912_s22, %s2323_s22   ;;  %s1862_s21 = sphi %s1910_s21, %s2322_s21   ;;  %s1858_s20 = sphi %s1908_s20, %s2321_s20   ;;  %s1854_s19 = sphi %s1906_s19, %s2320_s19   ;;  %s1850_s18 = sphi %s1904_s18, %s2319_s18  }
   0x5   : > { %s30_s26 = sadd.s32 1, %s1866_s22  ;;  %s169_s27 = sadd.s32 1, %s1858_s20 }
   0x6   : > { %p32_p0 = scmp.ge.s32.totalorder %s30_s26, 2  ;;  %p179_p1 = scmp.ne.s32.totalorder %s1858_s20, %s1854_s19 }
   0x7   : > { %p180_p2 = scmp.eq.s32.totalorder %s1337_s24, 1  ;;  %p185_p3 = scmp.ne.s32.totalorder %s1854_s19, %s1850_s18 }
   0x8   : > { %s2325_s26 = smov (%p32_p0, %s30_s26), 0  ;;  %p186_p5 = scmp.eq.s32.totalorder %s1338_s25, 1 }
   0x9   : > { %p1944_p4 = por %p180_p2, %p179_p1  ;;  %s164_s29 = ssub.s32 %s1866_s22, %s2325_s26 }
   0xa   : > { %p1344_p6 = scmp.ge.s32.totalorder %s1870_s23, 1  ;;  %p167_p7 = scmp.eq.s32.totalorder %s164_s29, 0 }
   0xb   : > { %p1951_p8 = por %p186_p5, %p185_p3  ;;  %p243_p9 = scmp.lt.s32.totalorder %s1870_s23, 3 }
   0xc   : > { %s1957_s6 = scalar_select %p167_p7, %s1858_s20, %s169_s27  }
   0xd   : > { %p244_p10 = pnand %p1344_p6, %p243_p9 }
   0xe   : > { %s1346_s13 = sshll.u32 (!%p244_p10), %s1862_s21, 5  ;;  %s285_s14 = sand.u32 (!%p244_p10), 1, %s1854_s19  }
   0xf   : > { %247 = sbr.rel (%p244_p10) target bundleno = 380 (0x17c), region = 40  ;;  %p289_p11 = scmp.lt.s32.totalorder (!%p244_p10), %s1346_s13, 63 }
  0x10   : > { %s1345_s24 = sshll.u32 (!%p244_p10), %s285_s14, 8  ;;  %s1812_s15 = scalar_lea.hbm (!%p244_p10), %s2316_s5, 512 }
  0x11   : > { %s2151_s25 = scalar_lea.vmem (!%p244_p10), [#allocation2], %s1345_s24 }
  0x12   : > { %s1208_s8 = sshll.u32 (!%p244_p10), %s2151_s25, 4  ;;  %s1209_s8 = int_to_ptr.vmem [resolvable:$true] %s1208_s8 }
  0x14   : > { %v1712_v0 = vld [vmem:[%s2314_s3 + $0x18] sm:$0xff]  ;;  %v1711_v3 = vld [vmem:[%s2314_s3 + $0x10] sm:$0xff]  ;;  %s2327_s13 = smov (!%p289_p11, %s1346_s13), 63  ;;  %v1710_v6 = vld [vmem:[%s2314_s3 + $0x8] sm:$0xff]  ;;  %vm522_vm0 = vcmask 523264  }
  0x15   : > { %v1684_v1 = vld [vmem:[%s2313_s2 + $0x38] sm:$0xff]  ;;  %575 = vmatpush.bf16.msra.mxu0 %v1712_v0  ;;  %1714 = vmatpush.bf16.msra.mxu3 %v1712_v0  ;;  %v1683_v4 = vld [vmem:[%s2313_s2 + $0x30] sm:$0xff]  ;;  %v1682_v7 = vld [vmem:[%s2313_s2 + $0x28] sm:$0xff]  ;;  %s1350_s11 = sshll.u32 %s2327_s13, 2  ;;  %s1644_s16 = sshll.u32 %s2327_s13, 3 }
  0x16   : > { %v1968_v2 = vld [vmem:[%s2313_s2 + $0x78] sm:$0xff]  ;;  %916 = vmatpush.bf16.msra.mxu1 %v1684_v1  ;;  %v1981_v5 = vld [vmem:[%s2313_s2 + $0x70] sm:$0xff]  ;;  %v1995_v8 = vld [vmem:[%s2313_s2 + $0x68] sm:$0xff]  ;;  %s2004_s17 = scalar_lea.vmem %s2312_s1, %s1350_s11  ;;  %s2039_s27 = scalar_lea.vmem %s2311_s0, %s1644_s16 }
  0x17   : > { %1005 = vmatpush.bf16.msra.mxu2 %v1968_v2  ;;  %v1709_v9 = vld [vmem:[%s2314_s3] sm:$0xff]  ;;  %v1706_v13 = vld [vmem:[%s2004_s17 + $0x68] sm:$0xff]  ;;  %v1680_v14 = vld [vmem:[%s2313_s2 + $0x18] sm:$0xff]  ;;  %s1195_s13 = scalar_lea.sflag [#allocation3], %s285_s14 }
  0x18   : > { %v1681_v10 = vld [vmem:[%s2313_s2 + $0x20] sm:$0xff]  ;;  %v2024_v15 = vld [vmem:[%s2313_s2 + $0x58] sm:$0xff]  ;;  %v1679_v16 = vld [vmem:[%s2313_s2 + $0x10] sm:$0xff] }
  0x19   : > { %576 = vmatpush.bf16.msra.mxu0 %v1711_v3  ;;  %1715 = vmatpush.bf16.msra.mxu3 %v1711_v3  ;;  %v2013_v11 = vld [vmem:[%s2313_s2 + $0x60] sm:$0xff]  ;;  %v1687_v17 = vld [vmem:[%s2313_s2 + $0x50] sm:$0xff]  ;;  %v1678_v18 = vld [vmem:[%s2313_s2 + $0x8] sm:$0xff] }
  0x1a   : > { %917 = vmatpush.bf16.msra.mxu1 %v1683_v4  ;;  %v1693_v12 = vld [vmem:[%s2004_s17] sm:$0xff]  ;;  %v1686_v19 = vld [vmem:[%s2313_s2 + $0x48] sm:$0xff]  ;;  %v1707_v27 = vld [vmem:[%s2004_s17 + $0x70] sm:$0xff] }
  0x1b   : > { %1006 = vmatpush.bf16.msra.mxu2 %v1981_v5  ;;  %v1677_v20 = vld [vmem:[%s2313_s2] sm:$0xff]  ;;  %v1646_v23 = vld [vmem:[%s2039_s27 + $0x4] sm:$0xf0]  ;;  %v1451_v25 = vld [vmem:[%s2039_s27 + $0x8] sm:$0xf0] }
  0x1c   : > { %v1685_v21 = vld [vmem:[%s2313_s2 + $0x40] sm:$0xff]  ;;  %v1694_v26 = vld [vmem:[%s2004_s17 + $0x8] sm:$0xff]  ;;  %v1457_v30 = vld [vmem:[%s2039_s27 + $0x10] sm:$0xf] }
  0x1d   : > { %577 = vmatpush.bf16.msra.mxu0 %v1710_v6  ;;  %1716 = vmatpush.bf16.msra.mxu3 %v1710_v6  ;;  %v1449_v22 = vld [vmem:[%s2039_s27] sm:$0xf]  ;;  %v1645_v24 = vld [vmem:[%s2039_s27 + $0x4] sm:$0xf]  ;;  %v1648_v31 = vld [vmem:[%s2039_s27 + $0x14] sm:$0xf0] }
  0x1e   : > { %918 = vmatpush.bf16.msra.mxu1 %v1682_v7  ;;  %v1450_v28 = vor.u32 %v1646_v23, %v1449_v22  ;;  %v1454_v29 = vor.u32 %v1645_v24, %v1451_v25  ;;  %v1647_v32 = vld [vmem:[%s2039_s27 + $0x14] sm:$0xf]  ;;  %v1459_v33 = vld [vmem:[%s2039_s27 + $0x18] sm:$0xf0]  ;;  %v1458_v36 = vor.u32 %v1648_v31, %v1457_v30  ;;  %v1465_v38 = vld [vmem:[%s2039_s27 + $0x20] sm:$0xf] }
  0x1f   : > { %1007 = vmatpush.bf16.msra.mxu2 %v1995_v8  ;;  %v1695_v34 = vld [vmem:[%s2004_s17 + $0x10] sm:$0xff]  ;;  %v1708_v35 = vld [vmem:[%s2004_s17 + $0x78] sm:$0xff]  ;;  %v1462_v37 = vor.u32 %v1647_v32, %v1459_v33  ;;  %v1545_v39 = vld [vmem:[%s2039_s27 + $0xc0] sm:$0xf] }
  0x20   : > { %v1670_v40 = vld [vmem:[%s2039_s27 + $0xc4] sm:$0xf0]  ;;  %v1649_v42 = vld [vmem:[%s2039_s27 + $0x24] sm:$0xf]  ;;  %v1467_v43 = vld [vmem:[%s2039_s27 + $0x28] sm:$0xf0] }
  0x21   : > { %578 = vmatpush.bf16.msra.mxu0 %v1709_v9  ;;  %1717 = vmatpush.bf16.msra.mxu3 %v1709_v9  ;;  %v1650_v41 = vld [vmem:[%s2039_s27 + $0x24] sm:$0xf0]  ;;  %v1696_v44 = vld [vmem:[%s2004_s17 + $0x18] sm:$0xff]  ;;  %v1546_v45 = vor.u32 %v1670_v40, %v1545_v39  ;;  %v1470_v47 = vor.u32 %v1649_v42, %v1467_v43  ;;  %v1473_v48 = vld [vmem:[%s2039_s27 + $0x30] sm:$0xf] }
  0x22   : > { %919 = vmatpush.bf16.msra.mxu1 %v1681_v10  ;;  %v1466_v46 = vor.u32 %v1650_v41, %v1465_v38  ;;  %v1553_v49 = vld [vmem:[%s2039_s27 + $0xd0] sm:$0xf]  ;;  %v1672_v50 = vld [vmem:[%s2039_s27 + $0xd4] sm:$0xf0]  ;;  %v1651_v52 = vld [vmem:[%s2039_s27 + $0x34] sm:$0xf] }
  0x23   : > { %1008 = vmatpush.bf16.msra.mxu2 %v2013_v11  ;;  %v1652_v51 = vld [vmem:[%s2039_s27 + $0x34] sm:$0xf0]  ;;  %v1475_v53 = vld [vmem:[%s2039_s27 + $0x38] sm:$0xf0]  ;;  %v1697_v54 = vld [vmem:[%s2004_s17 + $0x20] sm:$0xff]  ;;  %v1554_v55 = vor.u32 %v1672_v50, %v1553_v49 }
  0x24   : > { %1431 = vmatmul.msk.bf16.vlgmr.msra.gmra.mxu0 %vm522_vm0, %v1693_v12  ;;  %1444 = vmatmul.msk.bf16.vlgmr.msra.gmra.mxu3 %vm522_vm0, %v1706_v13  ;;  %v1474_v56 = vor.u32 %v1652_v51, %v1473_v48  ;;  %v1478_v57 = vor.u32 %v1651_v52, %v1475_v53  ;;  %v1481_v58 = vld [vmem:[%s2039_s27 + $0x40] sm:$0xf]  ;;  %v1674_v60 = vld [vmem:[%s2039_s27 + $0xe4] sm:$0xf0]  ;;  %v1653_v62 = vld [vmem:[%s2039_s27 + $0x44] sm:$0xf] }
  0x25   : > { %1718 = vmatpush.bf16.msrb.mxu3 %v1684_v1  ;;  %v1561_v59 = vld [vmem:[%s2039_s27 + $0xe0] sm:$0xf]  ;;  %v1654_v61 = vld [vmem:[%s2039_s27 + $0x44] sm:$0xf0]  ;;  %v1483_v63 = vld [vmem:[%s2039_s27 + $0x48] sm:$0xf0] }
  0x26   : > { %920 = vmatpush.bf16.msra.mxu1 %v1680_v14  ;;  %v1698_v0 = vld [vmem:[%s2004_s17 + $0x28] sm:$0xff]  ;;  %v1562_v1 = vor.u32 %v1674_v60, %v1561_v59  ;;  %v1486_v3 = vor.u32 %v1653_v62, %v1483_v63  ;;  %v1676_v6 = vld [vmem:[%s2039_s27 + $0xf4] sm:$0xf0]  ;;  %v1491_v9 = vld [vmem:[%s2039_s27 + $0x58] sm:$0xf0] }
  0x27   : > { %1009 = vmatpush.bf16.msra.mxu2 %v2024_v15  ;;  %v1505_v24 = vld [vmem:[%s2039_s27 + $0x70] sm:$0xf]  ;;  %v1671_v25 = vld [vmem:[%s2039_s27 + $0xd4] sm:$0xf]  ;;  %v1701_v30 = vld [vmem:[%s2004_s17 + $0x40] sm:$0xff] }
  0x28   : > { %v1673_v38 = vld [vmem:[%s2039_s27 + $0xe4] sm:$0xf]  ;;  %v1563_v39 = vld [vmem:[%s2039_s27 + $0xe8] sm:$0xf0]  ;;  %v1662_v40 = vld [vmem:[%s2039_s27 + $0x84] sm:$0xf0] }
  0x29   : > { %1719 = vmatpush.bf16.msrb.mxu3 %v1683_v4  ;;  %v1489_v4 = vld [vmem:[%s2039_s27 + $0x50] sm:$0xf]  ;;  %v1661_v41 = vld [vmem:[%s2039_s27 + $0x84] sm:$0xf]  ;;  %v1515_v42 = vld [vmem:[%s2039_s27 + $0x88] sm:$0xf0] }
  0x2a   : > { %921 = vmatpush.bf16.msra.mxu1 %v1679_v16  ;;  %v1518_v48 = vor.u32 %v1661_v41, %v1515_v42  ;;  %v2140_v52 = vld [vmem:[%s2315_s4] ss:$0 sm:$0xff]  ;;  %v1675_v60 = vld [vmem:[%s2039_s27 + $0xf4] sm:$0xf]  ;;  %v1664_v62 = vld [vmem:[%s2039_s27 + $0x94] sm:$0xf0] }
  0x2b   : > { %1010 = vmatpush.bf16.msra.mxu2 %v1687_v17  ;;  %v1663_v63 = vld [vmem:[%s2039_s27 + $0x94] sm:$0xf] }
  0x2d   : > { %1720 = vmatpush.bf16.msrb.mxu3 %v1682_v7  ;;  %v1656_v7 = vld [vmem:[%s2039_s27 + $0x54] sm:$0xf0] }
  0x2e   : > { %922 = vmatpush.bf16.msra.mxu1 %v1678_v18  ;;  %v1490_v12 = vor.u32 %v1656_v7, %v1489_v4  ;;  %v1703_v4 = vld [vmem:[%s2004_s17 + $0x50] sm:$0xff] }
  0x2f   : > { %1011 = vmatpush.bf16.msra.mxu2 %v1686_v19 }
  0x31   : > { %1721 = vmatpush.bf16.msrb.mxu3 %v1681_v10  ;;  %v1699_v10 = vld [vmem:[%s2004_s17 + $0x30] sm:$0xff] }
  0x32   : > { %923 = vmatpush.bf16.msra.mxu1 %v1677_v20 }
  0x33   : > { %1012 = vmatpush.bf16.msra.mxu2 %v1685_v21 }
  0x34   : > { %1432 = vmatmul.msk.bf16.gmra.mxu0 %vm522_vm0, %v1694_v26  ;;  %1445 = vmatmul.msk.bf16.gmra.mxu3 %vm522_vm0, %v1707_v27  ;;  %v1555_v26 = vld [vmem:[%s2039_s27 + $0xd8] sm:$0xf0]  ;;  %v1660_v27 = vld [vmem:[%s2039_s27 + $0x74] sm:$0xf0] }
  0x35   : > { %1722 = vmatpush.bf16.msrb.mxu3 %v1680_v14  ;;  %924 = vmatmul.bf16.vlgmr.msra.gmra.mxu1 %v1450_v28  ;;  %v1497_v14 = vld [vmem:[%s2039_s27 + $0x60] sm:$0xf]  ;;  %v1659_v28 = vld [vmem:[%s2039_s27 + $0x74] sm:$0xf]  ;;  %v1558_v31 = vor.u32 %v1671_v25, %v1555_v26  ;;  %v1506_v33 = vor.u32 %v1660_v27, %v1505_v24  ;;  %v1531_v24 = vld [vmem:[%s2039_s27 + $0xa8] sm:$0xf0] }
  0x36   : > { %1013 = vmatmul.bf16.vlgmr.msra.gmra.mxu2 %v1454_v29  ;;  %v1507_v29 = vld [vmem:[%s2039_s27 + $0x78] sm:$0xf0] }
  0x39   : > { %1723 = vmatpush.bf16.msrb.mxu3 %v1679_v16  ;;  %v1547_v16 = vld [vmem:[%s2039_s27 + $0xc8] sm:$0xf0] }
  0x3d   : > { %1724 = vmatpush.bf16.msrb.mxu3 %v1678_v18  ;;  %v1657_v18 = vld [vmem:[%s2039_s27 + $0x64] sm:$0xf] }
  0x41   : > { %1725 = vmatpush.bf16.msrb.mxu3 %v1677_v20  ;;  %v1700_v20 = vld [vmem:[%s2004_s17 + $0x38] sm:$0xff] }
  0x44   : > { %1433 = vmatmul.msk.bf16.gmra.mxu0 %vm522_vm0, %v1695_v34  ;;  %1446 = vmatmul.msk.bf16.gmra.mxu3 %vm522_vm0, %v1708_v35  ;;  %v1510_v34 = vor.u32 %v1659_v28, %v1507_v29  ;;  %v1704_v28 = vld [vmem:[%s2004_s17 + $0x58] sm:$0xff] }
  0x45   : > { %1726 = vmatpush.bf16.msra.mxu3 %v1968_v2  ;;  %929 = vmatmul.bf16.gmra.mxu1 %v1458_v36  ;;  %v1482_v2 = vor.u32 %v1654_v61, %v1481_v58  ;;  %v1521_v58 = vld [vmem:[%s2039_s27 + $0x90] sm:$0xf]  ;;  %v1571_v61 = vld [vmem:[%s2039_s27 + $0xf8] sm:$0xf0] }
  0x46   : > { %1018 = vmatmul.bf16.gmra.mxu2 %v1462_v37  ;;  %v1513_v37 = vld [vmem:[%s2039_s27 + $0x80] sm:$0xf] }
  0x49   : > { %1727 = vmatpush.bf16.msra.mxu3 %v1981_v5  ;;  %v1569_v5 = vld [vmem:[%s2039_s27 + $0xf0] sm:$0xf] }
  0x4d   : > { %1728 = vmatpush.bf16.msra.mxu3 %v1995_v8  ;;  %v1655_v8 = vld [vmem:[%s2039_s27 + $0x54] sm:$0xf] }
  0x4e   : > { %v1494_v13 = vor.u32 %v1655_v8, %v1491_v9  ;;  %v1522_v8 = vor.u32 %v1664_v62, %v1521_v58 }
  0x51   : > { %1729 = vmatpush.bf16.msra.mxu3 %v2013_v11  ;;  %v1570_v11 = vor.u32 %v1676_v6, %v1569_v5  ;;  %v1574_v5 = vor.u32 %v1675_v60, %v1571_v61 }
  0x54   : > { %1434 = vmatmul.msk.bf16.gmra.mxu0 %vm522_vm0, %v1696_v44  ;;  %984 = vmatmul.bf16.vlgmr.msrb.gmra.mxu3 %v1546_v45  ;;  %v1702_v44 = vld [vmem:[%s2004_s17 + $0x48] sm:$0xff]  ;;  %v1566_v45 = vor.u32 %v1673_v38, %v1563_v39 }
  0x55   : > { %1730 = vmatpush.bf16.msra.mxu3 %v2024_v15  ;;  %934 = vmatmul.bf16.gmra.mxu1 %v1466_v46  ;;  %v1669_v15 = vld [vmem:[%s2039_s27 + $0xc4] sm:$0xf] }
  0x56   : > { %1023 = vmatmul.bf16.gmra.mxu2 %v1470_v47  ;;  %v1514_v47 = vor.u32 %v1662_v40, %v1513_v37 }
  0x59   : > { %1731 = vmatpush.bf16.msra.mxu3 %v1687_v17  ;;  %v1658_v17 = vld [vmem:[%s2039_s27 + $0x64] sm:$0xf0] }
  0x5a   : > { %v1498_v22 = vor.u32 %v1658_v17, %v1497_v14 }
  0x5d   : > { %1732 = vmatpush.bf16.msra.mxu3 %v1686_v19  ;;  %v1499_v19 = vld [vmem:[%s2039_s27 + $0x68] sm:$0xf0] }
  0x5e   : > { %v1502_v23 = vor.u32 %v1657_v18, %v1499_v19 }
  0x61   : > { %1733 = vmatpush.bf16.msra.mxu3 %v1685_v21  ;;  %v1550_v21 = vor.u32 %v1669_v15, %v1547_v16 }
  0x64   : > { %1435 = vmatmul.msk.bf16.gmra.mxu0 %vm522_vm0, %v1697_v54  ;;  %989 = vmatmul.bf16.gmra.mxu3 %v1554_v55 }
  0x65   : > { %939 = vmatmul.bf16.gmra.mxu1 %v1474_v56 }
  0x66   : > { %1028 = vmatmul.bf16.gmra.mxu2 %v1478_v57 }
  0x74   : > { %1436 = vmatmul.msk.bf16.gmra.mxu0 %vm522_vm0, %v1698_v0  ;;  %994 = vmatmul.bf16.gmra.mxu3 %v1562_v1  ;;  %v1523_v0 = vld [vmem:[%s2039_s27 + $0x98] sm:$0xf0] }
  0x75   : > { %944 = vmatmul.bf16.gmra.mxu1 %v1482_v2  ;;  %v1526_v9 = vor.u32 %v1663_v63, %v1523_v0 }
  0x76   : > { %1033 = vmatmul.bf16.gmra.mxu2 %v1486_v3 }
  0x84   : > { %1437 = vmatmul.msk.bf16.gmra.mxu0 %vm522_vm0, %v1699_v10  ;;  %999 = vmatmul.bf16.gmra.mxu3 %v1570_v11 }
  0x85   : > { %949 = vmatmul.bf16.gmra.mxu1 %v1490_v12 }
  0x86   : > { %1038 = vmatmul.bf16.gmra.mxu2 %v1494_v13 }
  0x94   : > { %1438 = vmatmul.msk.bf16.gmra.mxu0 %vm522_vm0, %v1700_v20  ;;  %1073 = vmatmul.bf16.vlgmr.msra.gmra.mxu3 %v1550_v21  ;;  %v1529_v21 = vld [vmem:[%s2039_s27 + $0xa0] sm:$0xf] }
  0x95   : > { %954 = vmatmul.bf16.gmra.mxu1 %v1498_v22  ;;  %v1666_v22 = vld [vmem:[%s2039_s27 + $0xa4] sm:$0xf0] }
  0x96   : > { %1043 = vmatmul.bf16.gmra.mxu2 %v1502_v23  ;;  %v1665_v23 = vld [vmem:[%s2039_s27 + $0xa4] sm:$0xf] }
  0xa1   : > { %v580_v32 = vpop.f32.mrf.mxu0 }
  0xa4   : > { %1439 = vmatmul.msk.bf16.gmra.mxu0 %vm522_vm0, %v1701_v30  ;;  %1078 = vmatmul.bf16.gmra.mxu3 %v1558_v31  ;;  %v1530_v31 = vor.u32 %v1666_v22, %v1529_v21 }
  0xa5   : > { %959 = vmatmul.bf16.gmra.mxu1 %v1506_v33 }
  0xa6   : > { %1048 = vmatmul.bf16.gmra.mxu2 %v1510_v34 }
  0xa7   : > { %v2122_v35 = vpop.f32.mrf.mxu3 }
  0xa9   : > { %v582_v36 = vpop.f32.mrf.mxu0 }
  0xaf   : > { %v2130_v43 = vpop.f32.mrf.mxu3 }
  0xb1   : > { %v585_v46 = vpop.f32.mrf.mxu0 }
  0xb2   : > { %v925_v49 = vpop.f32.mrf.mxu1 }
  0xb3   : > { %v926_v50 = vadd.f32 %v925_v49, %v580_v32  ;;  %v1534_v32 = vor.u32 %v1665_v23, %v1531_v24  ;;  %v1539_v49 = vld [vmem:[%s2039_s27 + $0xb8] sm:$0xf0] }
  0xb4   : > { %1440 = vmatmul.msk.bf16.gmra.mxu0 %vm522_vm0, %v1702_v44  ;;  %1083 = vmatmul.bf16.gmra.mxu3 %v1566_v45 }
  0xb5   : > { %964 = vmatmul.bf16.gmra.mxu1 %v1514_v47  ;;  %v1668_v47 = vld [vmem:[%s2039_s27 + $0xb4] sm:$0xf0] }
  0xb6   : > { %1053 = vmatmul.bf16.gmra.mxu2 %v1518_v48  ;;  %v1667_v48 = vld [vmem:[%s2039_s27 + $0xb4] sm:$0xf] }
  0xb7   : > { %v2135_v51 = vpop.f32.mrf.mxu3 }
  0xb9   : > { %v1014_v53 = vpop.f32.mrf.mxu2  ;;  %v587_v55 = vpop.f32.mrf.mxu0 }
  0xba   : > { %v1015_v54 = vadd.f32 %v1014_v53, %v926_v50  ;;  %v927_v56 = vpop.f32.mrf.mxu1 }
  0xbb   : > { %v928_v1 = vadd.f32 %v927_v56, %v582_v36 }
  0xbc   : > { %v1098_v57 = vadd.f32 %v2140_v52, %v1015_v54 }
  0xbe   : > { %v1130_v59 = vmax.f32 %v1098_v57, 0.0 }
  0xbf   : > { %v2154_v2 = vpop.f32.mrf.mxu3 }
  0xc0   : > { %1162 = vst [vmem:[%s2151_s25] sm:$0xff] %v1130_v59  ;;  %v1542_v59 = vor.u32 %v1667_v48, %v1539_v49 }
  0xc1   : > { %v1016_v3 = vpop.f32.mrf.mxu2  ;;  %v590_v7 = vpop.f32.mrf.mxu0 }
  0xc2   : > { %v1017_v6 = vadd.f32 %v1016_v3, %v928_v1  ;;  %v930_v10 = vpop.f32.mrf.mxu1 }
  0xc3   : > { %v931_v13 = vadd.f32 %v930_v10, %v585_v46  ;;  %v1537_v46 = vld [vmem:[%s2039_s27 + $0xb0] sm:$0xf] }
  0xc4   : > { %v1099_v11 = vadd.f32 %v2140_v52, %v1017_v6  ;;  %1441 = vmatmul.msk.bf16.gmra.mxu0 %vm522_vm0, %v1703_v4  ;;  %1088 = vmatmul.bf16.gmra.mxu3 %v1574_v5  ;;  %v1538_v58 = vor.u32 %v1668_v47, %v1537_v46 }
  0xc5   : > { %969 = vmatmul.bf16.gmra.mxu1 %v1522_v8 }
  0xc6   : > { %v1131_v12 = vmax.f32 %v1099_v11, 0.0  ;;  %1058 = vmatmul.bf16.gmra.mxu2 %v1526_v9 }
  0xc7   : > { %v2160_v14 = vpop.f32.mrf.mxu3 }
  0xc8   : > { %1163 = vst [vmem:[%s2151_s25 + $0x8] sm:$0xff] %v1131_v12 }
  0xc9   : > { %v1019_v15 = vpop.f32.mrf.mxu2  ;;  %v592_v17 = vpop.f32.mrf.mxu0 }
  0xca   : > { %v1020_v16 = vadd.f32 %v1019_v15, %v931_v13  ;;  %v932_v18 = vpop.f32.mrf.mxu1 }
  0xcb   : > { %v933_v25 = vadd.f32 %v932_v18, %v587_v55  ;;  %v1705_v55 = vld [vmem:[%s2004_s17 + $0x60] sm:$0xff]  ;;  %s1713_s17 = sshll.u32 %s1862_s21, 8 }
  0xcc   : > { %v1100_v19 = vadd.f32 %v2140_v52, %v1020_v16  ;;  %s1207_s7 = scalar_lea.hbm %s2316_s5, %s1713_s17 }
  0xcd   : > { %s1210_s21 = sshll.u32 %s1207_s7, 4  ;;  %s1211_s21 = int_to_ptr.hbm [resolvable:$true] %s1210_s21 }
  0xce   : > { %v1132_v20 = vmax.f32 %v1100_v19, 0.0  ;;  %s1806_s9 = sshra.s32 %s1211_s21, 4  ;;  %s1807_s9 = int_to_ptr.hbm [resolvable:$true] %s1806_s9 }
  0xcf   : > { %v2168_v26 = vpop.f32.mrf.mxu3  ;;  %s1808_s10 = scalar_lea.hbm %s1807_s9, 256  ;;  %p1813_p1 = scmp.lt.s32.totalorder %s1807_s9, %s2316_s5 }
  0xd0   : > { %1164 = vst [vmem:[%s2151_s25 + $0x10] sm:$0xff] %v1132_v20  ;;  %p1809_p12 = scmp.ne.s32.totalorder %s1807_s9, %s1808_s10  ;;  %p1814_p2 = scmp.lt.s32.totalorder %s1812_s15, %s1808_s10 }
  0xd1   : > { %v1021_v27 = vpop.f32.mrf.mxu2  ;;  %v595_v30 = vpop.f32.mrf.mxu0 }
  0xd2   : > { %v1022_v29 = vadd.f32 %v1021_v27, %v933_v25  ;;  %v935_v33 = vpop.f32.mrf.mxu1  ;;  %p1810_p13 = pnand %p1809_p12, %p1944_p4  ;;  %p1815_p3 = por %p1814_p2, %p1813_p1 }
  0xd3   : > { %v936_v37 = vadd.f32 %v935_v33, %v590_v7 }
  0xd4   : > { %v1101_v34 = vadd.f32 %v2140_v52, %v1022_v29  ;;  %1442 = vmatmul.msk.bf16.gmra.mxu0 %vm522_vm0, %v1704_v28  ;;  %p1811_p0 = pneg %p1810_p13 }
  0xd5   : > { %974 = vmatmul.bf16.gmra.mxu1 %v1530_v31 }
  0xd6   : > { %v1133_v36 = vmax.f32 %v1101_v34, 0.0  ;;  %1063 = vmatmul.bf16.gmra.mxu2 %v1534_v32  ;;  %p1816_p5 = pnand %p1815_p3, %p1811_p0 }
  0xd7   : > { %v2174_v38 = vpop.f32.mrf.mxu3 }
  0xd8   : > { %1165 = vst [vmem:[%s2151_s25 + $0x18] sm:$0xff] %v1133_v36 }
  0xd9   : > { %v1024_v39 = vpop.f32.mrf.mxu2  ;;  %v597_v41 = vpop.f32.mrf.mxu0 }
  0xda   : > { %v1025_v40 = vadd.f32 %v1024_v39, %v936_v37  ;;  %v937_v42 = vpop.f32.mrf.mxu1 }
  0xdb   : > { %v938_v50 = vadd.f32 %v937_v42, %v592_v17 }
  0xdc   : > { %v1102_v44 = vadd.f32 %v2140_v52, %v1025_v40 }
  0xde   : > { %v1134_v45 = vmax.f32 %v1102_v44, 0.0 }
  0xdf   : > { %v2182_v53 = vpop.f32.mrf.mxu3 }
  0xe0   : > { %1166 = vst [vmem:[%s2151_s25 + $0x20] sm:$0xff] %v1134_v45 }
  0xe1   : > { %v1026_v54 = vpop.f32.mrf.mxu2  ;;  %v600_v57 = vpop.f32.mrf.mxu0 }
  0xe2   : > { %v1027_v56 = vadd.f32 %v1026_v54, %v938_v50  ;;  %v940_v60 = vpop.f32.mrf.mxu1 }
  0xe3   : > { %v941_v63 = vadd.f32 %v940_v60, %v595_v30 }
  0xe4   : > { %v1103_v61 = vadd.f32 %v2140_v52, %v1027_v56  ;;  %1443 = vmatmul.msk.bf16.gmra.mxu0 %vm522_vm0, %v1705_v55 }
  0xe5   : > { %979 = vmatmul.bf16.gmra.mxu1 %v1538_v58 }
  0xe6   : > { %v1135_v62 = vmax.f32 %v1103_v61, 0.0  ;;  %1068 = vmatmul.bf16.gmra.mxu2 %v1542_v59 }
  0xe7   : > { %v2188_v0 = vpop.f32.mrf.mxu3 }
  0xe8   : > { %1167 = vst [vmem:[%s2151_s25 + $0x28] sm:$0xff] %v1135_v62 }
  0xe9   : > { %v1029_v1 = vpop.f32.mrf.mxu2  ;;  %v602_v4 = vpop.f32.mrf.mxu0 }
  0xea   : > { %v1030_v3 = vadd.f32 %v1029_v1, %v941_v63  ;;  %v942_v5 = vpop.f32.mrf.mxu1 }
  0xeb   : > { %v943_v8 = vadd.f32 %v942_v5, %v597_v41 }
  0xec   : > { %v1104_v6 = vadd.f32 %v2140_v52, %v1030_v3 }
  0xee   : > { %v1136_v7 = vmax.f32 %v1104_v6, 0.0 }
  0xef   : > { %v2192_v9 = vpop.f32.mrf.mxu3 }
  0xf0   : > { %1168 = vst [vmem:[%s2151_s25 + $0x30] sm:$0xff] %v1136_v7 }
  0xf1   : > { %v1031_v10 = vpop.f32.mrf.mxu2  ;;  %v605_v12 = vpop.f32.mrf.mxu0 }
  0xf2   : > { %v1032_v11 = vadd.f32 %v1031_v10, %v943_v8  ;;  %v945_v13 = vpop.f32.mrf.mxu1 }
  0xf3   : > { %v946_v17 = vadd.f32 %v945_v13, %v600_v57 }
  0xf4   : > { %v1105_v15 = vadd.f32 %v2140_v52, %v1032_v11  ;;  %v991_v11 = vadd.f32 %v2188_v0, %v2122_v35 }
  0xf6   : > { %v1137_v16 = vmax.f32 %v1105_v15, 0.0 }
  0xf7   : > { %v2196_v18 = vpop.f32.mrf.mxu3 }
  0xf8   : > { %1169 = vst [vmem:[%s2151_s25 + $0x38] sm:$0xff] %v1137_v16 }
  0xf9   : > { %v1034_v19 = vpop.f32.mrf.mxu2  ;;  %v607_v21 = vpop.f32.mrf.mxu0 }
  0xfa   : > { %v1035_v20 = vadd.f32 %v1034_v19, %v946_v17  ;;  %v947_v22 = vpop.f32.mrf.mxu1 }
  0xfb   : > { %v948_v25 = vadd.f32 %v947_v22, %v602_v4 }
  0xfc   : > { %v1106_v23 = vadd.f32 %v2140_v52, %v1035_v20 }
  0xfe   : > { %v1138_v24 = vmax.f32 %v1106_v23, 0.0 }
  0xff   : > { %v2200_v27 = vpop.f32.mrf.mxu3 }
 0x100   : > { %1170 = vst [vmem:[%s2151_s25 + $0x40] sm:$0xff] %v1138_v24 }
 0x101   : > { %v1036_v28 = vpop.f32.mrf.mxu2  ;;  %v610_v30 = vpop.f32.mrf.mxu0 }
 0x102   : > { %v1037_v29 = vadd.f32 %v1036_v28, %v948_v25  ;;  %v950_v31 = vpop.f32.mrf.mxu1  ;;  %v993_v25 = vadd.f32 %v2192_v9, %v2130_v43  ;;  %v996_v43 = vadd.f32 %v2196_v18, %v2135_v51  ;;  %v998_v51 = vadd.f32 %v2200_v27, %v2154_v2 }
 0x103   : > { %v951_v34 = vadd.f32 %v950_v31, %v605_v12 }
 0x104   : > { %v1107_v32 = vadd.f32 %v2140_v52, %v1037_v29 }
 0x106   : > { %v1139_v33 = vmax.f32 %v1107_v32, 0.0 }
 0x107   : > { %v2204_v36 = vpop.f32.mrf.mxu3 }
 0x108   : > { %1171 = vst [vmem:[%s2151_s25 + $0x48] sm:$0xff] %v1139_v33  ;;  %v1001_v2 = vadd.f32 %v2204_v36, %v2160_v14 }
 0x109   : > { %v1039_v37 = vpop.f32.mrf.mxu2  ;;  %v612_v40 = vpop.f32.mrf.mxu0 }
 0x10a   : > { %v1040_v39 = vadd.f32 %v1039_v37, %v951_v34  ;;  %v952_v41 = vpop.f32.mrf.mxu1 }
 0x10b   : > { %v953_v45 = vadd.f32 %v952_v41, %v607_v21 }
 0x10c   : > { %v1108_v42 = vadd.f32 %v2140_v52, %v1040_v39 }
 0x10e   : > { %v1140_v44 = vmax.f32 %v1108_v42, 0.0 }
 0x10f   : > { %v2208_v46 = vpop.f32.mrf.mxu3 }
 0x110   : > { %1172 = vst [vmem:[%s2151_s25 + $0x50] sm:$0xff] %v1140_v44  ;;  %v1003_v14 = vadd.f32 %v2208_v46, %v2168_v26 }
 0x111   : > { %v1041_v47 = vpop.f32.mrf.mxu2  ;;  %v615_v49 = vpop.f32.mrf.mxu0 }
 0x112   : > { %v1042_v48 = vadd.f32 %v1041_v47, %v953_v45  ;;  %v955_v50 = vpop.f32.mrf.mxu1 }
 0x113   : > { %v956_v56 = vadd.f32 %v955_v50, %v610_v30 }
 0x114   : > { %v1109_v54 = vadd.f32 %v2140_v52, %v1042_v48 }
 0x116   : > { %v1141_v55 = vmax.f32 %v1109_v54, 0.0 }
 0x117   : > { %v2212_v57 = vpop.f32.mrf.mxu3 }
 0x118   : > { %1173 = vst [vmem:[%s2151_s25 + $0x58] sm:$0xff] %v1141_v55 }
 0x119   : > { %v1044_v58 = vpop.f32.mrf.mxu2  ;;  %v617_v60 = vpop.f32.mrf.mxu0 }
 0x11a   : > { %v1045_v59 = vadd.f32 %v1044_v58, %v956_v56  ;;  %v957_v61 = vpop.f32.mrf.mxu1 }
 0x11b   : > { %v958_v1 = vadd.f32 %v957_v61, %v612_v40 }
 0x11c   : > { %v1110_v62 = vadd.f32 %v2140_v52, %v1045_v59 }
 0x11e   : > { %v1142_v63 = vmax.f32 %v1110_v62, 0.0 }
 0x11f   : > { %v2216_v3 = vpop.f32.mrf.mxu3 }
 0x120   : > { %1174 = vst [vmem:[%s2151_s25 + $0x60] sm:$0xff] %v1142_v63 }
 0x121   : > { %v1046_v4 = vpop.f32.mrf.mxu2  ;;  %v620_v6 = vpop.f32.mrf.mxu0 }
 0x122   : > { %v1047_v5 = vadd.f32 %v1046_v4, %v958_v1  ;;  %v960_v7 = vpop.f32.mrf.mxu1 }
 0x123   : > { %v961_v12 = vadd.f32 %v960_v7, %v615_v49 }
 0x124   : > { %v1111_v8 = vadd.f32 %v2140_v52, %v1047_v5 }
 0x126   : > { %v1143_v10 = vmax.f32 %v1111_v8, 0.0 }
 0x127   : > { %v1079_v13 = vpop.f32.mrf.mxu3 }
 0x128   : > { %1175 = vst [vmem:[%s2151_s25 + $0x68] sm:$0xff] %v1143_v10  ;;  %v1080_v16 = vadd.f32 %v1079_v13, %v991_v11 }
 0x129   : > { %v1049_v15 = vpop.f32.mrf.mxu2  ;;  %v622_v19 = vpop.f32.mrf.mxu0 }
 0x12a   : > { %v1050_v17 = vadd.f32 %v1049_v15, %v961_v12  ;;  %v1124_v20 = vadd.f32 %v2140_v52, %v1080_v16  ;;  %v962_v21 = vpop.f32.mrf.mxu1 }
 0x12b   : > { %v963_v35 = vadd.f32 %v962_v21, %v617_v60 }
 0x12c   : > { %v1112_v22 = vadd.f32 %v2140_v52, %v1050_v17  ;;  %v1156_v23 = vmax.f32 %v1124_v20, 0.0 }
 0x12e   : > { %v1144_v24 = vmax.f32 %v1112_v22, 0.0  ;;  %1188 = vst [vmem:[%s2151_s25 + $0xd0] sm:$0xff] %v1156_v23 }
 0x12f   : > { %v1081_v0 = vpop.f32.mrf.mxu3 }
 0x130   : > { %1176 = vst [vmem:[%s2151_s25 + $0x70] sm:$0xff] %v1144_v24  ;;  %v1082_v29 = vadd.f32 %v1081_v0, %v993_v25 }
 0x131   : > { %v1051_v28 = vpop.f32.mrf.mxu2  ;;  %v625_v31 = vpop.f32.mrf.mxu0 }
 0x132   : > { %v1052_v30 = vadd.f32 %v1051_v28, %v963_v35  ;;  %v1125_v32 = vadd.f32 %v2140_v52, %v1082_v29  ;;  %v965_v33 = vpop.f32.mrf.mxu1 }
 0x133   : > { %v966_v9 = vadd.f32 %v965_v33, %v620_v6 }
 0x134   : > { %v1113_v34 = vadd.f32 %v2140_v52, %v1052_v30  ;;  %v1157_v37 = vmax.f32 %v1125_v32, 0.0 }
 0x136   : > { %v1145_v39 = vmax.f32 %v1113_v34, 0.0  ;;  %1189 = vst [vmem:[%s2151_s25 + $0xd8] sm:$0xff] %v1157_v37 }
 0x137   : > { %v1084_v40 = vpop.f32.mrf.mxu3 }
 0x138   : > { %1177 = vst [vmem:[%s2151_s25 + $0x78] sm:$0xff] %v1145_v39  ;;  %v1085_v42 = vadd.f32 %v1084_v40, %v996_v43 }
 0x139   : > { %v1054_v41 = vpop.f32.mrf.mxu2  ;;  %v627_v45 = vpop.f32.mrf.mxu0 }
 0x13a   : > { %v1055_v44 = vadd.f32 %v1054_v41, %v966_v9  ;;  %v1126_v47 = vadd.f32 %v2140_v52, %v1085_v42  ;;  %v967_v48 = vpop.f32.mrf.mxu1 }
 0x13b   : > { %v968_v18 = vadd.f32 %v967_v48, %v622_v19 }
 0x13c   : > { %v1114_v49 = vadd.f32 %v2140_v52, %v1055_v44  ;;  %v1158_v50 = vmax.f32 %v1126_v47, 0.0 }
 0x13e   : > { %v1146_v54 = vmax.f32 %v1114_v49, 0.0  ;;  %1190 = vst [vmem:[%s2151_s25 + $0xe0] sm:$0xff] %v1158_v50 }
 0x13f   : > { %v1086_v55 = vpop.f32.mrf.mxu3 }
 0x140   : > { %1178 = vst [vmem:[%s2151_s25 + $0x80] sm:$0xff] %v1146_v54  ;;  %v1087_v58 = vadd.f32 %v1086_v55, %v998_v51 }
 0x141   : > { %v1056_v56 = vpop.f32.mrf.mxu2  ;;  %v630_v60 = vpop.f32.mrf.mxu0 }
 0x142   : > { %v1057_v59 = vadd.f32 %v1056_v56, %v968_v18  ;;  %v1127_v61 = vadd.f32 %v2140_v52, %v1087_v58  ;;  %v970_v62 = vpop.f32.mrf.mxu1 }
 0x143   : > { %v971_v27 = vadd.f32 %v970_v62, %v625_v31 }
 0x144   : > { %v1115_v63 = vadd.f32 %v2140_v52, %v1057_v59  ;;  %v1159_v1 = vmax.f32 %v1127_v61, 0.0 }
 0x146   : > { %v1147_v4 = vmax.f32 %v1115_v63, 0.0  ;;  %1191 = vst [vmem:[%s2151_s25 + $0xe8] sm:$0xff] %v1159_v1 }
 0x147   : > { %v1089_v5 = vpop.f32.mrf.mxu3 }
 0x148   : > { %1179 = vst [vmem:[%s2151_s25 + $0x88] sm:$0xff] %v1147_v4  ;;  %v1090_v7 = vadd.f32 %v1089_v5, %v1001_v2 }
 0x149   : > { %v1059_v6 = vpop.f32.mrf.mxu2  ;;  %v632_v10 = vpop.f32.mrf.mxu0 }
 0x14a   : > { %v1060_v8 = vadd.f32 %v1059_v6, %v971_v27  ;;  %v1128_v11 = vadd.f32 %v2140_v52, %v1090_v7  ;;  %v972_v12 = vpop.f32.mrf.mxu1 }
 0x14b   : > { %v973_v36 = vadd.f32 %v972_v12, %v627_v45 }
 0x14c   : > { %v1116_v13 = vadd.f32 %v2140_v52, %v1060_v8  ;;  %v1160_v15 = vmax.f32 %v1128_v11, 0.0 }
 0x14e   : > { %v1148_v16 = vmax.f32 %v1116_v13, 0.0  ;;  %1192 = vst [vmem:[%s2151_s25 + $0xf0] sm:$0xff] %v1160_v15 }
 0x14f   : > { %v1091_v17 = vpop.f32.mrf.mxu3 }
 0x150   : > { %1180 = vst [vmem:[%s2151_s25 + $0x90] sm:$0xff] %v1148_v16  ;;  %v1092_v20 = vadd.f32 %v1091_v17, %v1003_v14 }
 0x151   : > { %v1061_v19 = vpop.f32.mrf.mxu2  ;;  %v635_v22 = vpop.f32.mrf.mxu0 }
 0x152   : > { %v1062_v21 = vadd.f32 %v1061_v19, %v973_v36  ;;  %v1129_v23 = vadd.f32 %v2140_v52, %v1092_v20  ;;  %v975_v24 = vpop.f32.mrf.mxu1 }
 0x153   : > { %v976_v28 = vadd.f32 %v975_v24, %v630_v60 }
 0x154   : > { %v1117_v25 = vadd.f32 %v2140_v52, %v1062_v21  ;;  %v1161_v35 = vmax.f32 %v1129_v23, 0.0 }
 0x156   : > { %v1149_v0 = vmax.f32 %v1117_v25, 0.0  ;;  %1193 = vst [vmem:[%s2151_s25 + $0xf8] sm:$0xff] %v1161_v35 }
 0x158   : > { %1181 = vst [vmem:[%s2151_s25 + $0x98] sm:$0xff] %v1149_v0 }
 0x159   : > { %v1064_v26 = vpop.f32.mrf.mxu2  ;;  %v637_v29 = vpop.f32.mrf.mxu0 }
 0x15a   : > { %v1065_v46 = vadd.f32 %v1064_v26, %v976_v28  ;;  %v977_v30 = vpop.f32.mrf.mxu1 }
 0x15b   : > { %v978_v33 = vadd.f32 %v977_v30, %v632_v10 }
 0x15c   : > { %v1118_v31 = vadd.f32 %v2140_v52, %v1065_v46 }
 0x15e   : > { %v1150_v32 = vmax.f32 %v1118_v31, 0.0 }
 0x160   : > { %1182 = vst [vmem:[%s2151_s25 + $0xa0] sm:$0xff] %v1150_v32 }
 0x161   : > { %v1066_v34 = vpop.f32.mrf.mxu2  ;;  %v640_v39 = vpop.f32.mrf.mxu0 }
 0x162   : > { %v1067_v37 = vadd.f32 %v1066_v34, %v978_v33  ;;  %v986_v43 = vadd.f32 %v2174_v38, %v640_v39  ;;  %v980_v9 = vpop.f32.mrf.mxu1 }
 0x163   : > { %v981_v45 = vadd.f32 %v980_v9, %v635_v22 }
 0x164   : > { %v1119_v40 = vadd.f32 %v2140_v52, %v1067_v37  ;;  %v1075_v41 = vadd.f32 %v2212_v57, %v986_v43 }
 0x166   : > { %v1151_v42 = vmax.f32 %v1119_v40, 0.0  ;;  %v1122_v44 = vadd.f32 %v2140_v52, %v1075_v41 }
 0x168   : > { %1183 = vst [vmem:[%s2151_s25 + $0xa8] sm:$0xff] %v1151_v42  ;;  %v1154_v47 = vmax.f32 %v1122_v44, 0.0 }
 0x169   : > { %v1069_v48 = vpop.f32.mrf.mxu2  ;;  %v642_v50 = vpop.f32.mrf.mxu0 }
 0x16a   : > { %v1070_v49 = vadd.f32 %v1069_v48, %v981_v45  ;;  %1186 = vst [vmem:[%s2151_s25 + $0xc0] sm:$0xff] %v1154_v47  ;;  %v988_v38 = vadd.f32 %v2182_v53, %v642_v50  ;;  %v982_v51 = vpop.f32.mrf.mxu1 }
 0x16b   : > { %v983_v56 = vadd.f32 %v982_v51, %v637_v29 }
 0x16c   : > { %v1120_v54 = vadd.f32 %v2140_v52, %v1070_v49  ;;  %v1077_v57 = vadd.f32 %v2216_v3, %v988_v38 }
 0x16e   : > { %v1152_v18 = vmax.f32 %v1120_v54, 0.0  ;;  %v1123_v55 = vadd.f32 %v2140_v52, %v1077_v57 }
 0x170   : > { %1184 = vst [vmem:[%s2151_s25 + $0xb0] sm:$0xff] %v1152_v18  ;;  %v1155_v58 = vmax.f32 %v1123_v55, 0.0 }
 0x171   : > { %v1071_v53 = vpop.f32.mrf.mxu2 }
 0x172   : > { %v1072_v59 = vadd.f32 %v1071_v53, %v983_v56  ;;  %1187 = vst [vmem:[%s2151_s25 + $0xc8] sm:$0xff] %v1155_v58 }
 0x174   : > { %v1121_v3 = vadd.f32 %v2140_v52, %v1072_v59 }
 0x176   : > { %v1153_v60 = vmax.f32 %v1121_v3, 0.0 }
 0x178   : > { %1185 = vst [vmem:[%s2151_s25 + $0xb8] sm:$0xff] %v1153_v60 }
 0x179   : > { %1819 = shalt.err (!%p1816_p5)
}
 0x17a   : > { %s1872_s14 = smov 128   ;;  %s1873_s25 = smov 8  }
 0x17b   : > { %1734 = dma.vmem_to_hbm [thread:$0]  (%p1944_p4), %s1209_s8, 4096, %s1211_s21, %s1195_s13, %s1872_s14, %s1872_s14, %s1873_s25  }
 0x17c PF: > { %p1740_p6 = scmp.ge.s32.totalorder %s1870_s23, 2  ;;  %s1225_s17 = sand.u32 1, %s1850_s18  }
 0x17d   : > { %s1226_s27 = scalar_lea.sflag [#allocation3], %s1225_s17 }
 0x17e   : > { %p1737_p7 = pnand %p1740_p6, %p1951_p8 }
 0x180   : > { %p1738_p9 = pneg %p1737_p7 }
 0x182   : > { %1845 = dma.done.wait (%p1738_p9), %s1226_s27, 4096  }
 0x183   : > { %1847 = vsyncadd (%p1738_p9), %s1226_s27, 4294963200  ;;  %s18_s23 = sadd.s32 1, %s1870_s23   ;;  %s2319_s18 = smov %s1854_s19 }
 0x184   : > { %p15_p10 = scmp.ge.s32.totalorder %s18_s23, 4   ;;  %s2320_s19 = smov %s1858_s20 }
 0x185   : > { %s2321_s20 = smov %s1957_s6  ;;  %s2322_s21 = smov %s1866_s22 }
 0x186   : > { %s2323_s22 = smov %s2325_s26  ;;  %17 = sbr.rel (!%p15_p10) target bundleno = 4 (0x4), region = 87 }
 0x18b   :  { %1232 = vsyncpa [#allocation3], 1 }
 0x18c   :  { %1234 = vsyncpa [#allocation3 + $0x1], 1 }

</bundles_post_ra>
